<compile_context>
chip_gen: v6e
topology: v6e:2x2x1
jax: 0.10.0
libtpu: 0.0.40
codegen_flags: <defaults>
</compile_context>

<pallas_src>
import functools

import jax
import jax.numpy as jnp
from jax import lax
from jax.experimental import pallas as pl
from jax.experimental.pallas import tpu as pltpu

LANES = 128       # feature dims padded to a full vreg lane width
NODE_ALIGN = 16   # node dim padded to the bf16 packed-sublane count ([16,128] vreg)


def _round_up(x, m):
    return (x + m - 1) // m * m


def _pad2(a, rows, cols, dtype):
    a = jnp.asarray(a, dtype)
    return jnp.pad(a, ((0, rows - a.shape[0]), (0, cols - a.shape[1])))


def _gnn_fused_kernel(*refs, num_layers):
    """All executed GIN layers fused into one invocation; everything VMEM-resident.

    refs layout:
      [0]             A_mask (Np, Np) bf16  adjacency mask (A>0), UNTRANSPOSED, zero-padded
      [1]             X      (Np, DP) f32   input node features, zero-padded
      [2 + 4*l + 0]   w1_l   (DP, DP) bf16  Linear1 with eval-mode BN folded in
      [2 + 4*l + 1]   b1_l   (1,  DP) f32   b1*bn_scale + bn_shift (zero-padded)
      [2 + 4*l + 2]   w2_l   (DP, DP) bf16  Linear2
      [2 + 4*l + 3]   b2_l   (1,  DP) f32   b2 (zero-padded)
      [2 + 4*num_layers]     out (Np, DP) f32
    """
    a_ref, x_ref = refs[0], refs[1]
    layer_refs = refs[2:2 + 4 * num_layers]
    out_ref = refs[2 + 4 * num_layers]

    a = a_ref[...]                         # bf16 (Np, Np)
    h = x_ref[...]                         # f32  (Np, DP), carried as a traced value
    for li in range(num_layers):
        w1, b1, w2, b2 = layer_refs[4 * li:4 * li + 4]
        # Sum-aggregation over incoming edges + self loop:
        #   agg[j, :] = sum_i A_mask[i, j] * h[i, :] + h[j, :]   (== (A>0)^T @ H + H)
        # Contract A's ROW axis so no transpose of the mask is ever materialized.
        agg = lax.dot_general(
            a, h.astype(jnp.bfloat16),
            dimension_numbers=(((0,), (0,)), ((), ())),
            preferred_element_type=jnp.float32) + h
        # MLP layer 1 (eval-mode BatchNorm affine folded into w1/b1) + inner ReLU.
        h1 = jnp.dot(agg.astype(jnp.bfloat16), w1[...],
                     preferred_element_type=jnp.float32) + b1[...]
        h1 = jnp.maximum(h1, 0.0)
        # MLP layer 2.
        h2 = jnp.dot(h1.astype(jnp.bfloat16), w2[...],
                     preferred_element_type=jnp.float32) + b2[...]
        if li < num_layers - 1:
            # Outer ReLU applied by GNN.forward between hidden GIN layers.
            h = jnp.maximum(h2, 0.0)
        else:
            out_ref[...] = h2.astype(out_ref.dtype)


def _vmem_budget_bytes(n_pad, d_pad, num_layers):
    """Resident footprint of the whole-array-in-VMEM design, with headroom."""
    mask_b = n_pad * n_pad * 2                       # bf16 adjacency mask
    feat_b = 2 * n_pad * d_pad * 4                   # X + out, f32
    layer_b = num_layers * (2 * d_pad * d_pad * 2 + 2 * d_pad * 4)
    need = mask_b + feat_b + layer_b
    # 2x + 4 MiB headroom for compiler temporaries; clamp to v7x physical VMEM.
    return min(2 * need + (4 << 20), 64 << 20)


def prepare_params(gc_params, *, depth, index=-1):
    """One-time preprocessing: BN fold + pad + bf16 cast of all executed layers.

    gc_params[i] = (w1, b1, (gamma, beta, running_mean, running_var, eps), w2, b2)
    Returns a flat tuple of device arrays consumed by gnn_forward.
    """
    layer_ids = list(range(depth)) + [index]
    dp = LANES
    arrays = []
    for lid in layer_ids:
        w1, b1, (gamma, beta, mean, var, eps), w2, b2 = gc_params[lid]
        # Eval-mode BatchNorm1d folded into Linear1:
        #   BN(z) = scale*(z - mean) + beta,  scale = gamma / sqrt(var + eps)
        scale = gamma / jnp.sqrt(var + eps)
        shift = beta - mean * scale
        w1_eff = w1 * scale[None, :]
        b1_eff = b1 * scale + shift
        arrays.append(_pad2(w1_eff, dp, dp, jnp.bfloat16))
        arrays.append(_pad2(b1_eff.reshape(1, -1), 1, dp, jnp.float32))
        arrays.append(_pad2(w2, dp, dp, jnp.bfloat16))
        arrays.append(_pad2(b2.reshape(1, -1), 1, dp, jnp.float32))
    return tuple(jax.device_put(a) for a in arrays)


@functools.partial(jax.jit, static_argnames=("out_dim",))
def gnn_forward(x, A, prepared_layers, *, out_dim):
    """GNN.forward (gnn_type='gin') in eval mode (dropout=identity, batch_norm=False)."""
    n = x.shape[0]
    num_layers = len(prepared_layers) // 4
    n_pad = _round_up(max(n, NODE_ALIGN), NODE_ALIGN)
    d_pad = LANES  # all feature dims here are <= 128 -> one vreg of lanes

    # bf16 adjacency mask (entries 0/1 are exact); NOT transposed, no eye added —
    # both are handled inside the kernel (transposed contraction + `+ H`).
    a_mask = _pad2((A > 0).astype(jnp.bfloat16), n_pad, n_pad, jnp.bfloat16)
    x_pad = _pad2(x, n_pad, d_pad, jnp.float32)

    inputs = [a_mask, x_pad, *prepared_layers]
    vmem = pl.BlockSpec(memory_space=pltpu.MemorySpace.VMEM)

    out_pad = pl.pallas_call(
        functools.partial(_gnn_fused_kernel, num_layers=num_layers),
        out_shape=jax.ShapeDtypeStruct((n_pad, d_pad), jnp.float32),
        in_specs=[vmem] * len(inputs),
        out_specs=vmem,
        compiler_params=pltpu.CompilerParams(
            vmem_limit_bytes=_vmem_budget_bytes(n_pad, d_pad, num_layers)),
    )(*inputs)

    return out_pad[:n, :out_dim]


def gnn_reference(x, A, gc_params, *, depth, index=-1):
    """Pure-JAX f32 reference of the eval-mode forward."""
    n = x.shape[0]
    s = (A > 0).astype(jnp.float32).T + jnp.eye(n, dtype=jnp.float32)
    layer_ids = list(range(depth)) + [index]
    h = x
    for pos, lid in enumerate(layer_ids):
        w1, b1, (gamma, beta, mean, var, eps), w2, b2 = gc_params[lid]
        agg = s @ h
        scale = gamma / jnp.sqrt(var + eps)
        z = (agg @ w1 + b1 - mean) * scale + beta
        z = jnp.maximum(z, 0.0)
        z = z @ w2 + b2
        h = jnp.maximum(z, 0.0) if pos < len(layer_ids) - 1 else z
    return h


def make_gin_params(key, in_dim, out_dim):
    """Deterministic synthetic parameters for one GINConv (raw BN params)."""
    k1, k2, k3, k4 = jax.random.split(key, 4)
    w1 = jax.random.normal(k1, (in_dim, in_dim), jnp.float32) * 0.1
    b1 = jax.random.normal(k2, (in_dim,), jnp.float32) * 0.1
    gamma = jnp.ones((in_dim,), jnp.float32)
    beta = jnp.zeros((in_dim,), jnp.float32)
    running_mean = jnp.zeros((in_dim,), jnp.float32)
    running_var = jnp.ones((in_dim,), jnp.float32)
    eps = 1e-5
    w2 = jax.random.normal(k3, (in_dim, out_dim), jnp.float32) * 0.1
    b2 = jax.random.normal(k4, (out_dim,), jnp.float32) * 0.1
    return (w1, b1, (gamma, beta, running_mean, running_var, eps), w2, b2)


if __name__ == "__main__":
    # Small shapes consistent with the module (depth = len(nhid) = 1).
    N = 16        # number of nodes
    nfeat = 8
    nhid = [32]
    nclass = 4
    out_dim = 8
    depth = len(nhid)

    key = jax.random.PRNGKey(0)
    kx, kA, k0, k1, k2 = jax.random.split(key, 5)

    x = jax.random.normal(kx, (N, nfeat), jnp.float32)
    A = (jax.random.uniform(kA, (N, N)) > 0.7).astype(jnp.float32)

    # gc list: depth+2 layers -> [nfeat->nhid0, nhid0->nclass, nhid0->out_dim]
    gc_params = [
        make_gin_params(k0, nfeat, nhid[0]),
        make_gin_params(k1, nhid[0], nclass),
        make_gin_params(k2, nhid[0], out_dim),
    ]

    # One-time parameter preparation (BN fold + pad + bf16 cast), hoisted out of
    # the per-call path.
    prepared = prepare_params(gc_params, depth=depth, index=-1)

    out = gnn_forward(x, A, prepared, out_dim=out_dim)
    out = jax.block_until_ready(out)
    assert out.shape == (N, out_dim), out.shape

    # Correctness check vs. pure-JAX f32 reference (bf16 MXU inputs -> loose tol).
    ref = gnn_reference(x, A, gc_params, depth=depth, index=-1)
    max_err = float(jnp.max(jnp.abs(out - ref)))
    assert max_err < 5e-2, f"max abs error {max_err}"

    print("KERNEL_OK")
</pallas_src>

<mosaic_0001>
module attributes {stable_mosaic.version = 11 : i64} {
  func.func @_gnn_fused_kernel(%arg0: memref<16x16xbf16, #tpu.memory_space<vmem>>, %arg1: memref<16x128xf32, #tpu.memory_space<vmem>>, %arg2: memref<128x128xbf16, #tpu.memory_space<vmem>>, %arg3: memref<1x128xf32, #tpu.memory_space<vmem>>, %arg4: memref<128x128xbf16, #tpu.memory_space<vmem>>, %arg5: memref<1x128xf32, #tpu.memory_space<vmem>>, %arg6: memref<128x128xbf16, #tpu.memory_space<vmem>>, %arg7: memref<1x128xf32, #tpu.memory_space<vmem>>, %arg8: memref<128x128xbf16, #tpu.memory_space<vmem>>, %arg9: memref<1x128xf32, #tpu.memory_space<vmem>>, %arg10: memref<16x128xf32, #tpu.memory_space<vmem>>) attributes {dimension_semantics = [], scalar_prefetch = 0 : i64, scratch_operands = 0 : i64, tpu.core_type = #tpu.core_type<tc>} {
    %c0 = arith.constant 0 : index
    %c0_0 = arith.constant 0 : index
    %0 = vector.load %arg0[%c0, %c0_0] : memref<16x16xbf16, #tpu.memory_space<vmem>>, vector<16x16xbf16>
    %c0_1 = arith.constant 0 : index
    %c0_2 = arith.constant 0 : index
    %1 = vector.load %arg1[%c0_1, %c0_2] : memref<16x128xf32, #tpu.memory_space<vmem>>, vector<16x128xf32>
    %2 = arith.truncf %1 : vector<16x128xf32> to vector<16x128xbf16>
    %cst = arith.constant dense<0.000000e+00> : vector<16x128xf32>
    %3 = tpu.matmul %0, %2, %cst {dimension_numbers = #tpu.dot_dimension_numbers<[0], [0], [1], [1], [0, 1, 1, 1], [], []>} : vector<16x16xbf16>, vector<16x128xbf16>, vector<16x128xf32> -> vector<16x128xf32>
    %4 = arith.addf %3, %1 : vector<16x128xf32>
    %5 = arith.truncf %4 : vector<16x128xf32> to vector<16x128xbf16>
    %c0_3 = arith.constant 0 : index
    %c0_4 = arith.constant 0 : index
    %6 = vector.load %arg2[%c0_3, %c0_4] : memref<128x128xbf16, #tpu.memory_space<vmem>>, vector<128x128xbf16>
    %cst_5 = arith.constant dense<0.000000e+00> : vector<16x128xf32>
    %7 = tpu.matmul %5, %6, %cst_5 {dimension_numbers = #tpu.dot_dimension_numbers<[1], [0], [0], [1], [0, 0, 1, 1], [], []>} : vector<16x128xbf16>, vector<128x128xbf16>, vector<16x128xf32> -> vector<16x128xf32>
    %c0_6 = arith.constant 0 : index
    %c0_7 = arith.constant 0 : index
    %8 = vector.load %arg3[%c0_6, %c0_7] : memref<1x128xf32, #tpu.memory_space<vmem>>, vector<1x128xf32>
    %9 = vector.broadcast %8 : vector<1x128xf32> to vector<16x128xf32>
    %10 = arith.addf %7, %9 : vector<16x128xf32>
    %cst_8 = arith.constant 0.000000e+00 : f32
    %11 = vector.broadcast %cst_8 : f32 to vector<16x128xf32>
    %12 = arith.maximumf %10, %11 : vector<16x128xf32>
    %13 = arith.truncf %12 : vector<16x128xf32> to vector<16x128xbf16>
    %c0_9 = arith.constant 0 : index
    %c0_10 = arith.constant 0 : index
    %14 = vector.load %arg4[%c0_9, %c0_10] : memref<128x128xbf16, #tpu.memory_space<vmem>>, vector<128x128xbf16>
    %cst_11 = arith.constant dense<0.000000e+00> : vector<16x128xf32>
    %15 = tpu.matmul %13, %14, %cst_11 {dimension_numbers = #tpu.dot_dimension_numbers<[1], [0], [0], [1], [0, 0, 1, 1], [], []>} : vector<16x128xbf16>, vector<128x128xbf16>, vector<16x128xf32> -> vector<16x128xf32>
    %c0_12 = arith.constant 0 : index
    %c0_13 = arith.constant 0 : index
    %16 = vector.load %arg5[%c0_12, %c0_13] : memref<1x128xf32, #tpu.memory_space<vmem>>, vector<1x128xf32>
    %17 = vector.broadcast %16 : vector<1x128xf32> to vector<16x128xf32>
    %18 = arith.addf %15, %17 : vector<16x128xf32>
    %cst_14 = arith.constant 0.000000e+00 : f32
    %19 = vector.broadcast %cst_14 : f32 to vector<16x128xf32>
    %20 = arith.maximumf %18, %19 : vector<16x128xf32>
    %21 = arith.truncf %20 : vector<16x128xf32> to vector<16x128xbf16>
    %cst_15 = arith.constant dense<0.000000e+00> : vector<16x128xf32>
    %22 = tpu.matmul %0, %21, %cst_15 {dimension_numbers = #tpu.dot_dimension_numbers<[0], [0], [1], [1], [0, 1, 1, 1], [], []>} : vector<16x16xbf16>, vector<16x128xbf16>, vector<16x128xf32> -> vector<16x128xf32>
    %23 = arith.addf %22, %20 : vector<16x128xf32>
    %24 = arith.truncf %23 : vector<16x128xf32> to vector<16x128xbf16>
    %c0_16 = arith.constant 0 : index
    %c0_17 = arith.constant 0 : index
    %25 = vector.load %arg6[%c0_16, %c0_17] : memref<128x128xbf16, #tpu.memory_space<vmem>>, vector<128x128xbf16>
    %cst_18 = arith.constant dense<0.000000e+00> : vector<16x128xf32>
    %26 = tpu.matmul %24, %25, %cst_18 {dimension_numbers = #tpu.dot_dimension_numbers<[1], [0], [0], [1], [0, 0, 1, 1], [], []>} : vector<16x128xbf16>, vector<128x128xbf16>, vector<16x128xf32> -> vector<16x128xf32>
    %c0_19 = arith.constant 0 : index
    %c0_20 = arith.constant 0 : index
    %27 = vector.load %arg7[%c0_19, %c0_20] : memref<1x128xf32, #tpu.memory_space<vmem>>, vector<1x128xf32>
    %28 = vector.broadcast %27 : vector<1x128xf32> to vector<16x128xf32>
    %29 = arith.addf %26, %28 : vector<16x128xf32>
    %cst_21 = arith.constant 0.000000e+00 : f32
    %30 = vector.broadcast %cst_21 : f32 to vector<16x128xf32>
    %31 = arith.maximumf %29, %30 : vector<16x128xf32>
    %32 = arith.truncf %31 : vector<16x128xf32> to vector<16x128xbf16>
    %c0_22 = arith.constant 0 : index
    %c0_23 = arith.constant 0 : index
    %33 = vector.load %arg8[%c0_22, %c0_23] : memref<128x128xbf16, #tpu.memory_space<vmem>>, vector<128x128xbf16>
    %cst_24 = arith.constant dense<0.000000e+00> : vector<16x128xf32>
    %34 = tpu.matmul %32, %33, %cst_24 {dimension_numbers = #tpu.dot_dimension_numbers<[1], [0], [0], [1], [0, 0, 1, 1], [], []>} : vector<16x128xbf16>, vector<128x128xbf16>, vector<16x128xf32> -> vector<16x128xf32>
    %c0_25 = arith.constant 0 : index
    %c0_26 = arith.constant 0 : index
    %35 = vector.load %arg9[%c0_25, %c0_26] : memref<1x128xf32, #tpu.memory_space<vmem>>, vector<1x128xf32>
    %36 = vector.broadcast %35 : vector<1x128xf32> to vector<16x128xf32>
    %37 = arith.addf %34, %36 : vector<16x128xf32>
    %c0_27 = arith.constant 0 : index
    %c0_28 = arith.constant 0 : index
    %38 = vector.load %arg10[%c0_27, %c0_28] : memref<16x128xf32, #tpu.memory_space<vmem>>, vector<16x128xf32>
    tpu.vector_store %arg10[%c0_27, %c0_28], %37 {strides = array<i32>} : memref<16x128xf32, #tpu.memory_space<vmem>>, vector<16x128xf32>,
    return
  }
}

</mosaic_0001>

<bundles_post_ra>
// kernel: gnn_forward.1
= control target key start
LH: loop header
LB: loop body
LE: loop exit
PB: predicated region body
PF: predicated region fallthrough
CT: control target
= control target key end

     0   :  { %15 = vsyncpa [#allocation3], 0  ;;  %s1107_s0 = inlined_call_operand.vmem [shape: bf16[16,16], index: 0, kind: input, shape index: {}]   ;;  %s1108_s1 = inlined_call_operand.vmem [shape: f32[16,128], index: 1, kind: input, shape index: {}]   ;;  %s1109_s2 = inlined_call_operand.vmem [shape: bf16[128,128], index: 2, kind: input, shape index: {}]   ;;  %s1110_s3 = inlined_call_operand.vmem [shape: f32[1,128], index: 3, kind: input, shape index: {}]   ;;  %s1111_s4 = inlined_call_operand.hbm [shape: bf16[128,128], index: 4, kind: input, shape index: {}]   ;;  %s1112_s5 = inlined_call_operand.vmem [shape: f32[1,128], index: 5, kind: input, shape index: {}]   ;;  %s1113_s6 = inlined_call_operand.hbm [shape: bf16[128,128], index: 6, kind: input, shape index: {}]   ;;  %s1114_s7 = inlined_call_operand.vmem [shape: f32[1,128], index: 7, kind: input, shape index: {}]   ;;  %s1115_s8 = inlined_call_operand.hbm [shape: bf16[128,128], index: 8, kind: input, shape index: {}]   ;;  %s1116_s9 = inlined_call_operand.vmem [shape: f32[1,128], index: 9, kind: input, shape index: {}]   ;;  %s1117_s10 = inlined_call_operand.vmem [shape: f32[16,128], index: 10, kind: output, shape index: {}]  }
   0x1   :  { %16 = vsyncpa [#allocation5], 0  ;;  %s933_s13 = smov [#allocation4]   ;;  %s934_s15 = smov [#allocation2]  }
   0x2   :  { %s44_s14 = sshll.u32 %s933_s13, 4  ;;  %s30_s16 = sshll.u32 %s934_s15, 4  ;;  %s45_s14 = int_to_ptr.vmem [resolvable:$true] %s44_s14  ;;  %s31_s16 = int_to_ptr.vmem [resolvable:$true] %s30_s16 }
   0x3   :  { %s877_s17 = scalar_lea.vmem %s45_s14, 1024  ;;  %p882_p1 = scmp.lt.s32.totalorder %s45_s14, %s45_s14 }
   0x4   :  { %p878_p0 = scmp.ne.s32.totalorder %s45_s14, %s877_s17  ;;  %p883_p2 = scmp.lt.s32.totalorder %s877_s17, %s877_s17 }
   0x6   :  { %p884_p3 = por %p883_p2, %p882_p1 }
   0x8   :  { %p885_p4 = pnand %p884_p3, %p878_p0 }
   0xa   :  { %888 = shalt.err (!%p885_p4)
}
   0xb   :  { %s935_s18 = smov 64   ;;  %s936_s19 = smov 4  }
   0xc   :  { %50 = dma.hbm_to_vmem [thread:$0]  %s1113_s6, 1024, %s45_s14, [#allocation5], %s935_s18, %s935_s18, %s936_s19  }
   0xd   :  { %s897_s22 = scalar_lea.vmem %s31_s16, 1024  ;;  %p902_p6 = scmp.lt.s32.totalorder %s31_s16, %s31_s16 }
   0xe   :  { %p898_p5 = scmp.ne.s32.totalorder %s31_s16, %s897_s22  ;;  %p903_p7 = scmp.lt.s32.totalorder %s897_s22, %s897_s22 }
  0x10   :  { %p904_p8 = por %p903_p7, %p902_p6 }
  0x12   :  { %p905_p9 = pnand %p904_p8, %p898_p5 }
  0x14   :  { %908 = shalt.err (!%p905_p9)
}
  0x15   :  { %36 = dma.hbm_to_vmem [thread:$0]  %s1111_s4, 1024, %s31_s16, [#allocation3], %s935_s18, %s935_s18, %s936_s19  }
  0x16   :  { %s937_s25 = smov [#allocation6]  }
  0x17   :  { %s58_s26 = sshll.u32 %s937_s25, 4  ;;  %s59_s26 = int_to_ptr.vmem [resolvable:$true] %s58_s26 }
  0x18   :  { %s917_s27 = scalar_lea.vmem %s59_s26, 1024  ;;  %p922_p11 = scmp.lt.s32.totalorder %s59_s26, %s59_s26 }
  0x19   :  { %p918_p10 = scmp.ne.s32.totalorder %s59_s26, %s917_s27  ;;  %p923_p12 = scmp.lt.s32.totalorder %s917_s27, %s917_s27 }
  0x1b   :  { %p924_p13 = por %p923_p12, %p922_p11 }
  0x1d   :  { %p925_p0 = pnand %p924_p13, %p918_p10 }
  0x1f   :  { %928 = shalt.err (!%p925_p0)
}
  0x20   :  { %64 = dma.hbm_to_vmem [thread:$0]  %s1115_s8, 1024, %s59_s26, [#allocation5], %s935_s18, %s935_s18, %s936_s19  }
  0x21   :  { %929 = dma.done.wait [#allocation3], 1024  }
  0x22   :  { %930 = vsyncadd [#allocation3], 4294966272 }
  0x23   :  { %931 = dma.done.wait [#allocation5], 2048  }
  0x24   :  { %932 = vsyncadd [#allocation5], 4294965248  ;;  %v938_v0 = vmov 0.0   ;;  %vm939_vm0 = vmmov 0   ;;  %v836_v1 = vld [vmem:[%s1107_s0] sm:$0xff]   ;;  %v80_v3 = vld [vmem:[%s1108_s1 + $0x8] sm:$0xff] }
  0x25   :  { %736 = vmatprep.subr.bf16.mxu0 %v938_v0  ;;  %738 = vmatprep.mubr.msk.bf16.mxu0 %vm939_vm0, %v938_v0  ;;  %v79_v2 = vld [vmem:[%s1108_s1] sm:$0xff]  ;;  %v837_v5 = vld [vmem:[%s1109_s2 + $0x38] sm:$0xff]   ;;  %v838_v6 = vld [vmem:[%s1109_s2 + $0x30] sm:$0xff]   ;;  %vm104_vm1 = vcmask 130048  }
  0x26   :  { %742 = vmatprep.subr.bf16.mxu1 %v938_v0  ;;  %758 = vmatprep.mubr.msk.bf16.mxu1 %vm939_vm0, %v938_v0  ;;  %v81_v4 = vpack.c.bf16 %v80_v3, %v79_v2  ;;  %v839_v7 = vld [vmem:[%s1109_s2 + $0x28] sm:$0xff]   ;;  %v840_v8 = vld [vmem:[%s1109_s2 + $0x20] sm:$0xff]   ;;  %v841_v9 = vld [vmem:[%s1109_s2 + $0x18] sm:$0xff]  }
  0x27   :  { %88 = vxpose.xlu0.c.b16.start.end [1/1] (short) (narrow) %v836_v1, 16  ;;  %743 = vmatpush3.bf16.msra.mxu1 %v837_v5  ;;  %v842_v10 = vld [vmem:[%s1109_s2 + $0x10] sm:$0xff]   ;;  %v843_v12 = vld [vmem:[%s1109_s2 + $0x8] sm:$0xff]   ;;  %v844_v13 = vld [vmem:[%s1109_s2] sm:$0xff]  }
  0x28   :  { %737 = vmatpush3.bf16.msra.mxu0 %v81_v4  ;;  %744 = vmatprep.subr.bf16.mxu1 %v938_v0  ;;  %v845_v14 = vld [vmem:[#allocation2 + $0x38] sm:$0xff]   ;;  %v846_v15 = vld [vmem:[#allocation2 + $0x30] sm:$0xff]   ;;  %v847_v16 = vld [vmem:[#allocation2 + $0x28] sm:$0xff]  }
  0x29   :  { %762 = vmatprep.subr.bf16.mxu0 %v938_v0  ;;  %v848_v17 = vld [vmem:[#allocation2 + $0x20] sm:$0xff]   ;;  %v849_v18 = vld [vmem:[#allocation2 + $0x18] sm:$0xff]   ;;  %v850_v26 = vld [vmem:[#allocation2 + $0x10] sm:$0xff]  }
  0x2a   :  { %v851_v27 = vld [vmem:[#allocation2 + $0x8] sm:$0xff]   ;;  %v852_v28 = vld [vmem:[#allocation2] sm:$0xff]   ;;  %v853_v39 = vld [vmem:[#allocation4 + $0x38] sm:$0xff]  }
  0x2b   :  { %745 = vmatpush3.bf16.msra.mxu1 %v838_v6  ;;  %v659_v29 = vld [vmem:[%s1110_s3] ss:$0 sm:$0xff]  ;;  %v854_v40 = vld [vmem:[#allocation4 + $0x30] sm:$0xff]   ;;  %v855_v41 = vld [vmem:[#allocation4 + $0x28] sm:$0xff]  }
  0x2c   :  { %746 = vmatprep.subr.bf16.mxu1 %v938_v0  ;;  %v856_v42 = vld [vmem:[#allocation4 + $0x20] sm:$0xff]   ;;  %v857_v43 = vld [vmem:[#allocation4 + $0x18] sm:$0xff]   ;;  %v858_v44 = vld [vmem:[#allocation4 + $0x10] sm:$0xff]  }
  0x2d   :  { %v668_v45 = vld [vmem:[%s1112_s5] ss:$0 sm:$0xff]  ;;  %v859_v55 = vld [vmem:[#allocation4 + $0x8] sm:$0xff]   ;;  %v861_v57 = vld [vmem:[#allocation6 + $0x38] sm:$0xff]  }
  0x2e   :  { %v860_v56 = vld [vmem:[#allocation4] sm:$0xff]   ;;  %v862_v58 = vld [vmem:[#allocation6 + $0x30] sm:$0xff]   ;;  %v863_v59 = vld [vmem:[#allocation6 + $0x28] sm:$0xff]  }
  0x2f   :  { %747 = vmatpush3.bf16.msra.mxu1 %v839_v7  ;;  %v864_v60 = vld [vmem:[#allocation6 + $0x20] sm:$0xff]   ;;  %v865_v61 = vld [vmem:[#allocation6 + $0x18] sm:$0xff]   ;;  %v866_v6 = vld [vmem:[#allocation6 + $0x10] sm:$0xff]  }
  0x30   :  { %748 = vmatprep.subr.bf16.mxu1 %v938_v0  ;;  %v867_v7 = vld [vmem:[#allocation6 + $0x8] sm:$0xff]  }
  0x33   :  { %749 = vmatpush3.bf16.msra.mxu1 %v840_v8  ;;  %v868_v8 = vld [vmem:[#allocation6] sm:$0xff]  }
  0x34   :  { %750 = vmatprep.subr.bf16.mxu1 %v938_v0 }
  0x37   :  { %751 = vmatpush3.bf16.msra.mxu1 %v841_v9  ;;  %v678_v9 = vld [vmem:[%s1114_s7] ss:$0 sm:$0xff] }
  0x38   :  { %752 = vmatprep.subr.bf16.mxu1 %v938_v0 }
  0x3b   :  { %753 = vmatpush3.bf16.msra.mxu1 %v842_v10 }
  0x3c   :  { %754 = vmatprep.subr.bf16.mxu1 %v938_v0 }
  0x3f   :  { %755 = vmatpush3.bf16.msra.mxu1 %v843_v12 }
  0x40   :  { %756 = vmatprep.subr.bf16.mxu1 %v938_v0 }
  0x43   :  { %757 = vmatpush3.bf16.msra.mxu1 %v844_v13 }
  0x44   :  { %782 = vmatprep.subr.bf16.mxu1 %v938_v0 }
  0x89   :  { %v1044_v11 = vpop.trf.xlu0 }
  0x8a   :  { %739 = vmatmul.mubr.msk.bf16.vlgmr.msra.gmra.mxu0 %vm104_vm1, %v1044_v11 }
  0x8b   :  { %778 = vmatprep.mubr.msk.bf16.mxu0 %vm939_vm0, %v938_v0  ;;  %763 = vmatpush3.bf16.msra.mxu0 %v845_v14 }
  0x8c   :  { %764 = vmatprep.subr.bf16.mxu0 %v938_v0 }
  0x8f   :  { %765 = vmatpush3.bf16.msra.mxu0 %v846_v15 }
  0x90   :  { %766 = vmatprep.subr.bf16.mxu0 %v938_v0 }
  0x93   :  { %767 = vmatpush3.bf16.msra.mxu0 %v847_v16 }
  0x94   :  { %768 = vmatprep.subr.bf16.mxu0 %v938_v0 }
  0x97   :  { %769 = vmatpush3.bf16.msra.mxu0 %v848_v17 }
  0x98   :  { %770 = vmatprep.subr.bf16.mxu0 %v938_v0 }
  0x9b   :  { %771 = vmatpush3.bf16.msra.mxu0 %v849_v18 }
  0x9c   :  { %772 = vmatprep.subr.bf16.mxu0 %v938_v0 }
  0x9f   :  { %773 = vmatpush3.bf16.msra.mxu0 %v850_v26 }
  0xa0   :  { %774 = vmatprep.subr.bf16.mxu0 %v938_v0 }
  0xa3   :  { %775 = vmatpush3.bf16.msra.mxu0 %v851_v27 }
  0xa4   :  { %776 = vmatprep.subr.bf16.mxu0 %v938_v0 }
  0xa7   :  { %777 = vmatpush3.bf16.msra.mxu0 %v852_v28 }
  0xa8   :  { %788 = vmatprep.subr.bf16.mxu0 %v938_v0 }
 0x14a   :  { %v142_v19 = vpop.f32.mrf.mxu0 }
 0x14b   :  { %v143_v22 = vadd.f32 %v142_v19, %v79_v2 }
 0x14c   :  { %v740_v20 = vpop.f32.mrf.mxu0 }
 0x14e   :  { %v145_v21 = vpop.f32.mrf.mxu0 }
 0x14f   :  { %v146_v23 = vadd.f32 %v145_v21, %v80_v3 }
 0x150   :  { %v741_v24 = vpop.f32.mrf.mxu0 }
 0x151   :  { %v149_v25 = vpack.c.bf16 %v146_v23, %v143_v22 }
 0x153   :  { %759 = vmatmul.mubr.bf16.vlgmr.msra.gmra.mxu1 %v149_v25 }
 0x154   :  { %784 = vmatprep.mubr.msk.bf16.mxu1 %vm939_vm0, %v938_v0 }
 0x213   :  { %v255_v30 = vpop.f32.mrf.mxu1 }
 0x214   :  { %v256_v32 = vadd.f32 %v659_v29, %v255_v30 }
 0x215   :  { %v760_v31 = vpop.f32.mrf.mxu1 }
 0x216   :  { %v262_v36 = vmax.f32 %v256_v32, 0.0 }
 0x217   :  { %v258_v33 = vpop.f32.mrf.mxu1 }
 0x218   :  { %v259_v34 = vadd.f32 %v659_v29, %v258_v33 }
 0x219   :  { %v761_v35 = vpop.f32.mrf.mxu1 }
 0x21a   :  { %v263_v37 = vmax.f32 %v259_v34, 0.0 }
 0x21c   :  { %v264_v38 = vpack.c.bf16 %v263_v37, %v262_v36 }
 0x21e   :  { %779 = vmatmul.mubr.bf16.vlgmr.msra.gmra.mxu0 %v264_v38 }
 0x21f   :  { %804 = vmatprep.mubr.msk.bf16.mxu0 %vm939_vm0, %v938_v0  ;;  %789 = vmatpush3.bf16.msra.mxu0 %v853_v39 }
 0x220   :  { %790 = vmatprep.subr.bf16.mxu0 %v938_v0 }
 0x223   :  { %791 = vmatpush3.bf16.msra.mxu0 %v854_v40 }
 0x224   :  { %792 = vmatprep.subr.bf16.mxu0 %v938_v0 }
 0x227   :  { %793 = vmatpush3.bf16.msra.mxu0 %v855_v41 }
 0x228   :  { %794 = vmatprep.subr.bf16.mxu0 %v938_v0 }
 0x22b   :  { %795 = vmatpush3.bf16.msra.mxu0 %v856_v42 }
 0x22c   :  { %796 = vmatprep.subr.bf16.mxu0 %v938_v0 }
 0x22f   :  { %797 = vmatpush3.bf16.msra.mxu0 %v857_v43 }
 0x230   :  { %798 = vmatprep.subr.bf16.mxu0 %v938_v0 }
 0x233   :  { %799 = vmatpush3.bf16.msra.mxu0 %v858_v44 }
 0x234   :  { %800 = vmatprep.subr.bf16.mxu0 %v938_v0 }
 0x237   :  { %801 = vmatpush3.bf16.msra.mxu0 %v859_v55 }
 0x238   :  { %802 = vmatprep.subr.bf16.mxu0 %v938_v0 }
 0x23b   :  { %803 = vmatpush3.bf16.msra.mxu0 %v860_v56 }
 0x2de   :  { %v370_v46 = vpop.f32.mrf.mxu0 }
 0x2df   :  { %v371_v48 = vadd.f32 %v668_v45, %v370_v46 }
 0x2e0   :  { %v780_v47 = vpop.f32.mrf.mxu0 }
 0x2e1   :  { %v377_v52 = vmax.f32 %v371_v48, 0.0 }
 0x2e2   :  { %v373_v49 = vpop.f32.mrf.mxu0 }
 0x2e3   :  { %v374_v50 = vadd.f32 %v668_v45, %v373_v49 }
 0x2e4   :  { %v781_v51 = vpop.f32.mrf.mxu0 }
 0x2e5   :  { %v378_v53 = vmax.f32 %v374_v50, 0.0 }
 0x2e7   :  { %v379_v54 = vpack.c.bf16 %v378_v53, %v377_v52 }
 0x2e9   :  { %783 = vmatpush3.bf16.msra.mxu1 %v379_v54 }
 0x2ea   :  { %808 = vmatprep.subr.bf16.mxu1 %v938_v0 }
 0x2ec   :  { %785 = vmatmul.mubr.msk.bf16.vlgmr.msra.gmra.mxu1 %vm104_vm1, %v1044_v11 }
 0x2ed   :  { %824 = vmatprep.mubr.msk.bf16.mxu1 %vm939_vm0, %v938_v0  ;;  %809 = vmatpush3.bf16.msra.mxu1 %v861_v57 }
 0x2ee   :  { %810 = vmatprep.subr.bf16.mxu1 %v938_v0 }
 0x2f1   :  { %811 = vmatpush3.bf16.msra.mxu1 %v862_v58 }
 0x2f2   :  { %812 = vmatprep.subr.bf16.mxu1 %v938_v0 }
 0x2f5   :  { %813 = vmatpush3.bf16.msra.mxu1 %v863_v59 }
 0x2f6   :  { %814 = vmatprep.subr.bf16.mxu1 %v938_v0 }
 0x2f9   :  { %815 = vmatpush3.bf16.msra.mxu1 %v864_v60 }
 0x2fa   :  { %816 = vmatprep.subr.bf16.mxu1 %v938_v0 }
 0x2fd   :  { %817 = vmatpush3.bf16.msra.mxu1 %v865_v61 }
 0x2fe   :  { %818 = vmatprep.subr.bf16.mxu1 %v938_v0 }
 0x301   :  { %819 = vmatpush3.bf16.msra.mxu1 %v866_v6 }
 0x302   :  { %820 = vmatprep.subr.bf16.mxu1 %v938_v0 }
 0x305   :  { %821 = vmatpush3.bf16.msra.mxu1 %v867_v7 }
 0x306   :  { %822 = vmatprep.subr.bf16.mxu1 %v938_v0  ;;  %v687_v0 = vld [vmem:[%s1116_s9] ss:$0 sm:$0xff] }
 0x309   :  { %823 = vmatpush3.bf16.msra.mxu1 %v868_v8 }
 0x3ac   :  { %v414_v62 = vpop.f32.mrf.mxu1 }
 0x3ad   :  { %v415_v2 = vadd.f32 %v414_v62, %v377_v52 }
 0x3ae   :  { %v786_v63 = vpop.f32.mrf.mxu1 }
 0x3b0   :  { %v417_v1 = vpop.f32.mrf.mxu1 }
 0x3b1   :  { %v418_v3 = vadd.f32 %v417_v1, %v378_v53 }
 0x3b2   :  { %v787_v4 = vpop.f32.mrf.mxu1 }
 0x3b3   :  { %v421_v5 = vpack.c.bf16 %v418_v3, %v415_v2 }
 0x3b5   :  { %805 = vmatmul.mubr.bf16.vlgmr.msra.gmra.mxu0 %v421_v5 }
 0x475   :  { %v527_v10 = vpop.f32.mrf.mxu0 }
 0x476   :  { %v528_v12 = vadd.f32 %v678_v9, %v527_v10 }
 0x477   :  { %v806_v11 = vpop.f32.mrf.mxu0 }
 0x478   :  { %v534_v16 = vmax.f32 %v528_v12, 0.0 }
 0x479   :  { %v530_v13 = vpop.f32.mrf.mxu0 }
 0x47a   :  { %v531_v14 = vadd.f32 %v678_v9, %v530_v13 }
 0x47b   :  { %v807_v15 = vpop.f32.mrf.mxu0 }
 0x47c   :  { %v535_v17 = vmax.f32 %v531_v14, 0.0 }
 0x47e   :  { %v536_v18 = vpack.c.bf16 %v535_v17, %v534_v16 }
 0x480   :  { %825 = vmatmul.mubr.bf16.vlgmr.msra.gmra.mxu1 %v536_v18 }
 0x540   :  { %v642_v19 = vpop.f32.mrf.mxu1 }
 0x541   :  { %v643_v20 = vadd.f32 %v687_v0, %v642_v19 }
 0x542   :  { %v826_v21 = vpop.f32.mrf.mxu1 }
 0x543   :  { %649 = vst [vmem:[%s1117_s10] sm:$0xff] %v643_v20 }
 0x544   :  { %v645_v22 = vpop.f32.mrf.mxu1 }
 0x545   :  { %v646_v23 = vadd.f32 %v687_v0, %v645_v22 }
 0x546   :  { %v827_v24 = vpop.f32.mrf.mxu1 }
 0x547   :  { %650 = vst [vmem:[%s1117_s10 + $0x8] sm:$0xff] %v646_v23 }
 0x548   :  { %655 = vsyncpa [#allocation3], 1 }
 0x549   :  { %656 = vsyncpa [#allocation5], 1 }

</bundles_post_ra>
